<compile_context>
chip_gen: v7x
topology: tpu7x:2x2x1
jax: 0.10.0
libtpu: 0.0.40
codegen_flags: <defaults>
</compile_context>

<pallas_src>
import functools

import jax
import jax.numpy as jnp
from jax.experimental import pallas as pl
from jax.experimental.pallas import tpu as pltpu


def _dice_partial_kernel(x_ref, t_ref, inter_ref, xsum_ref, tsum_ref, *,
                         rows_total: int, tile_rows: int, ragged: bool):
    r = pl.program_id(1)

    @pl.when(r == 0)
    def _init():
        inter_ref[...] = jnp.zeros_like(inter_ref)
        xsum_ref[...] = jnp.zeros_like(xsum_ref)
        tsum_ref[...] = jnp.zeros_like(tsum_ref)

    x = x_ref[...].astype(jnp.float32)          # (tile_rows, 128)
    t = t_ref[...].astype(jnp.float32)

    if ragged:
        # The last row-tile can run past the real row count; out-of-bounds
        # VMEM contents are undefined (NOT zero), so mask before summing.
        row_ids = r * tile_rows + jax.lax.broadcasted_iota(
            jnp.int32, (tile_rows, 128), 0)
        valid = row_ids < rows_total
        x = jnp.where(valid, x, 0.0)
        t = jnp.where(valid, t, 0.0)

    # Fold the block into (8, 128) lane/sublane-wise partial sums with plain
    # VPU adds over the vreg-index axis -- no per-step cross-lane (XLU) work.
    xr = x.reshape(tile_rows // 8, 8, 128)
    tr = t.reshape(tile_rows // 8, 8, 128)
    inter_ref[...] += jnp.sum(xr * tr, axis=0)
    xsum_ref[...] += jnp.sum(xr, axis=0)
    tsum_ref[...] += jnp.sum(tr, axis=0)


def _pick_tile_rows(rows: int, max_itemsize: int,
                    block_bytes_budget: int = 2 * 1024 * 1024) -> int:
    """Largest legal row-tile: multiple of the sublane quantum, <= budget."""
    mult = max(8, 32 // max_itemsize)            # f32 -> 8, bf16 -> 16, i8 -> 32
    cap = max(mult,
              (block_bytes_budget // (128 * max_itemsize)) // mult * mult)
    rows_up = ((rows + mult - 1) // mult) * mult
    return min(cap, rows_up)


def dice_loss(output: jax.Array, target: jax.Array,
              smooth: float = 1e-05) -> jax.Array:
    """Pallas implementation of DiceLoss.forward(output, target, smooth)."""
    assert output.shape == target.shape
    batch = output.shape[0]

    # Flatten each sample (free, contiguous reshape -- no HBM copy).
    x = output.reshape(batch, -1)
    t = target.reshape(batch, -1)
    n = x.shape[1]

    # View each sample as (rows, 128).  N = C*H*W is almost always a multiple
    # of 128; if not, pad by < 128 zeros (zeros do not change any of the sums).
    lane_pad = (-n) % 128
    if lane_pad:
        # TODO(synk): rare path -- costs one extra HBM round trip of the inputs.
        x = jnp.pad(x, ((0, 0), (0, lane_pad)))
        t = jnp.pad(t, ((0, 0), (0, lane_pad)))
    rows = (n + lane_pad) // 128
    x3 = x.reshape(batch, rows, 128)
    t3 = t.reshape(batch, rows, 128)

    max_itemsize = max(x3.dtype.itemsize, t3.dtype.itemsize)
    tile_rows = _pick_tile_rows(rows, max_itemsize)
    num_row_tiles = pl.cdiv(rows, tile_rows)
    ragged = (rows % tile_rows) != 0

    kernel = functools.partial(_dice_partial_kernel, rows_total=rows,
                               tile_rows=tile_rows, ragged=ragged)

    # Inputs keep their caller dtype through the DMA (bf16 / int8 masks stream
    # at reduced HBM bytes); accumulation is always f32.
    in_spec = pl.BlockSpec((None, tile_rows, 128), lambda b, r: (b, r, 0))
    out_spec = pl.BlockSpec((None, 8, 128), lambda b, r: (b, 0, 0))
    part_shape = jax.ShapeDtypeStruct((batch, 8, 128), jnp.float32)

    inter_p, xsum_p, tsum_p = pl.pallas_call(
        kernel,
        out_shape=(part_shape, part_shape, part_shape),
        grid_spec=pltpu.PrefetchScalarGridSpec(
            num_scalar_prefetch=0,
            grid=(batch, num_row_tiles),
            in_specs=[in_spec, in_spec],
            out_specs=(out_spec, out_spec, out_spec),
        ),
        compiler_params=pltpu.CompilerParams(
            dimension_semantics=("parallel", "arbitrary")),
    )(x3, t3)

    # Tiny epilogue in plain JAX: one cross-lane reduce per sample + dice.
    inter = jnp.sum(inter_p.reshape(batch, -1), axis=1)
    xsum = jnp.sum(xsum_p.reshape(batch, -1), axis=1)
    tsum = jnp.sum(tsum_p.reshape(batch, -1), axis=1)
    dice = 2.0 * (inter + smooth) / (xsum + tsum + smooth)
    return 1.0 - jnp.sum(dice) / batch


def _dice_loss_ref(output, target, smooth=1e-05):
    batch = target.shape[0]
    inp = output.reshape(batch, -1).astype(jnp.float32)
    tgt = target.reshape(batch, -1).astype(jnp.float32)
    inter = jnp.sum(inp * tgt, axis=1)
    loss = 2.0 * (inter + smooth) / (
        jnp.sum(inp, axis=1) + jnp.sum(tgt, axis=1) + smooth)
    return 1.0 - jnp.sum(loss) / batch


if __name__ == "__main__":
    key = jax.random.PRNGKey(0)
    k1, k2 = jax.random.split(key)

    B, C, H, W = 2, 4, 16, 16
    # "output" as probabilities, "target" as a binary mask - typical Dice usage.
    output = jax.nn.sigmoid(jax.random.normal(k1, (B, C, H, W), dtype=jnp.float32))
    target = (jax.random.uniform(k2, (B, C, H, W)) > 0.5).astype(jnp.float32)

    loss = dice_loss(output, target)
    loss = jax.block_until_ready(loss)

    ref = _dice_loss_ref(output, target)
    assert jnp.allclose(loss, ref, rtol=1e-5, atol=1e-6), (loss, ref)

    print("KERNEL_OK")
</pallas_src>

<mosaic_0001>
module attributes {stable_mosaic.version = 11 : i64} {
  func.func @_dice_partial_kernel(%arg0: i32, %arg1: i32, %arg2: memref<1x8x128xf32, #tpu.memory_space<vmem>>, %arg3: memref<1x8x128xf32, #tpu.memory_space<vmem>>, %arg4: memref<1x8x128xf32, #tpu.memory_space<vmem>>, %arg5: memref<1x8x128xf32, #tpu.memory_space<vmem>>, %arg6: memref<1x8x128xf32, #tpu.memory_space<vmem>>) attributes {dimension_semantics = [#tpu.dimension_semantics<parallel>, #tpu.dimension_semantics<arbitrary>], iteration_bounds = array<i64: 2, 1>, scalar_prefetch = 0 : i64, scratch_operands = 0 : i64, tpu.core_type = #tpu.core_type<tc>, window_params = [{transform_indices = @transform_0, window_bounds = array<i64: 1, 8, 128>}, {transform_indices = @transform_1, window_bounds = array<i64: 1, 8, 128>}, {transform_indices = @transform_2, window_bounds = array<i64: 1, 8, 128>}, {transform_indices = @transform_3, window_bounds = array<i64: 1, 8, 128>}, {transform_indices = @transform_4, window_bounds = array<i64: 1, 8, 128>}]} {
    %c0_i32 = arith.constant 0 : i32
    %0 = arith.cmpi eq, %arg1, %c0_i32 : i32
    %1 = arith.extui %0 : i1 to i32
    %c0_i32_0 = arith.constant 0 : i32
    %2 = arith.cmpi ne, %1, %c0_i32_0 : i32
    scf.if %2 {
      %cst_26 = arith.constant 0.000000e+00 : f32
      %31 = vector.broadcast %cst_26 : f32 to vector<8x128xf32>
      %c0_27 = arith.constant 0 : index
      %c0_28 = arith.constant 0 : index
      %c0_29 = arith.constant 0 : index
      %32 = vector.load %arg4[%c0_27, %c0_28, %c0_29] : memref<1x8x128xf32, #tpu.memory_space<vmem>>, vector<1x8x128xf32>
      %33 = vector.shape_cast %32 : vector<1x8x128xf32> to vector<8x128xf32>
      %34 = vector.shape_cast %31 : vector<8x128xf32> to vector<1x8x128xf32>
      tpu.vector_store %arg4[%c0_27, %c0_28, %c0_29], %34 {strides = array<i32>} : memref<1x8x128xf32, #tpu.memory_space<vmem>>, vector<1x8x128xf32>,
      %cst_30 = arith.constant 0.000000e+00 : f32
      %35 = vector.broadcast %cst_30 : f32 to vector<8x128xf32>
      %c0_31 = arith.constant 0 : index
      %c0_32 = arith.constant 0 : index
      %c0_33 = arith.constant 0 : index
      %36 = vector.load %arg5[%c0_31, %c0_32, %c0_33] : memref<1x8x128xf32, #tpu.memory_space<vmem>>, vector<1x8x128xf32>
      %37 = vector.shape_cast %36 : vector<1x8x128xf32> to vector<8x128xf32>
      %38 = vector.shape_cast %35 : vector<8x128xf32> to vector<1x8x128xf32>
      tpu.vector_store %arg5[%c0_31, %c0_32, %c0_33], %38 {strides = array<i32>} : memref<1x8x128xf32, #tpu.memory_space<vmem>>, vector<1x8x128xf32>,
      %cst_34 = arith.constant 0.000000e+00 : f32
      %39 = vector.broadcast %cst_34 : f32 to vector<8x128xf32>
      %c0_35 = arith.constant 0 : index
      %c0_36 = arith.constant 0 : index
      %c0_37 = arith.constant 0 : index
      %40 = vector.load %arg6[%c0_35, %c0_36, %c0_37] : memref<1x8x128xf32, #tpu.memory_space<vmem>>, vector<1x8x128xf32>
      %41 = vector.shape_cast %40 : vector<1x8x128xf32> to vector<8x128xf32>
      %42 = vector.shape_cast %39 : vector<8x128xf32> to vector<1x8x128xf32>
      tpu.vector_store %arg6[%c0_35, %c0_36, %c0_37], %42 {strides = array<i32>} : memref<1x8x128xf32, #tpu.memory_space<vmem>>, vector<1x8x128xf32>,
    } else {
    }
    %c0 = arith.constant 0 : index
    %c0_1 = arith.constant 0 : index
    %c0_2 = arith.constant 0 : index
    %3 = vector.load %arg2[%c0, %c0_1, %c0_2] : memref<1x8x128xf32, #tpu.memory_space<vmem>>, vector<1x8x128xf32>
    %4 = vector.shape_cast %3 : vector<1x8x128xf32> to vector<8x128xf32>
    %c0_3 = arith.constant 0 : index
    %c0_4 = arith.constant 0 : index
    %c0_5 = arith.constant 0 : index
    %5 = vector.load %arg3[%c0_3, %c0_4, %c0_5] : memref<1x8x128xf32, #tpu.memory_space<vmem>>, vector<1x8x128xf32>
    %6 = vector.shape_cast %5 : vector<1x8x128xf32> to vector<8x128xf32>
    %7 = vector.shape_cast %4 : vector<8x128xf32> to vector<1x8x128xf32>
    %8 = vector.shape_cast %6 : vector<8x128xf32> to vector<1x8x128xf32>
    %c0_6 = arith.constant 0 : index
    %c0_7 = arith.constant 0 : index
    %c0_8 = arith.constant 0 : index
    %9 = vector.load %arg4[%c0_6, %c0_7, %c0_8] : memref<1x8x128xf32, #tpu.memory_space<vmem>>, vector<1x8x128xf32>
    %10 = vector.shape_cast %9 : vector<1x8x128xf32> to vector<8x128xf32>
    %11 = arith.mulf %7, %8 : vector<1x8x128xf32>
    %cst = arith.constant dense<0.000000e+00> : vector<8x128xf32>
    %12 = vector.multi_reduction <add>, %11, %cst [0] : vector<1x8x128xf32> to vector<8x128xf32>
    %13 = arith.addf %10, %12 : vector<8x128xf32>
    %c0_9 = arith.constant 0 : index
    %c0_10 = arith.constant 0 : index
    %c0_11 = arith.constant 0 : index
    %14 = vector.load %arg4[%c0_9, %c0_10, %c0_11] : memref<1x8x128xf32, #tpu.memory_space<vmem>>, vector<1x8x128xf32>
    %15 = vector.shape_cast %14 : vector<1x8x128xf32> to vector<8x128xf32>
    %16 = vector.shape_cast %13 : vector<8x128xf32> to vector<1x8x128xf32>
    tpu.vector_store %arg4[%c0_9, %c0_10, %c0_11], %16 {strides = array<i32>} : memref<1x8x128xf32, #tpu.memory_space<vmem>>, vector<1x8x128xf32>,
    %c0_12 = arith.constant 0 : index
    %c0_13 = arith.constant 0 : index
    %c0_14 = arith.constant 0 : index
    %17 = vector.load %arg5[%c0_12, %c0_13, %c0_14] : memref<1x8x128xf32, #tpu.memory_space<vmem>>, vector<1x8x128xf32>
    %18 = vector.shape_cast %17 : vector<1x8x128xf32> to vector<8x128xf32>
    %cst_15 = arith.constant dense<0.000000e+00> : vector<8x128xf32>
    %19 = vector.multi_reduction <add>, %7, %cst_15 [0] : vector<1x8x128xf32> to vector<8x128xf32>
    %20 = arith.addf %18, %19 : vector<8x128xf32>
    %c0_16 = arith.constant 0 : index
    %c0_17 = arith.constant 0 : index
    %c0_18 = arith.constant 0 : index
    %21 = vector.load %arg5[%c0_16, %c0_17, %c0_18] : memref<1x8x128xf32, #tpu.memory_space<vmem>>, vector<1x8x128xf32>
    %22 = vector.shape_cast %21 : vector<1x8x128xf32> to vector<8x128xf32>
    %23 = vector.shape_cast %20 : vector<8x128xf32> to vector<1x8x128xf32>
    tpu.vector_store %arg5[%c0_16, %c0_17, %c0_18], %23 {strides = array<i32>} : memref<1x8x128xf32, #tpu.memory_space<vmem>>, vector<1x8x128xf32>,
    %c0_19 = arith.constant 0 : index
    %c0_20 = arith.constant 0 : index
    %c0_21 = arith.constant 0 : index
    %24 = vector.load %arg6[%c0_19, %c0_20, %c0_21] : memref<1x8x128xf32, #tpu.memory_space<vmem>>, vector<1x8x128xf32>
    %25 = vector.shape_cast %24 : vector<1x8x128xf32> to vector<8x128xf32>
    %cst_22 = arith.constant dense<0.000000e+00> : vector<8x128xf32>
    %26 = vector.multi_reduction <add>, %8, %cst_22 [0] : vector<1x8x128xf32> to vector<8x128xf32>
    %27 = arith.addf %25, %26 : vector<8x128xf32>
    %c0_23 = arith.constant 0 : index
    %c0_24 = arith.constant 0 : index
    %c0_25 = arith.constant 0 : index
    %28 = vector.load %arg6[%c0_23, %c0_24, %c0_25] : memref<1x8x128xf32, #tpu.memory_space<vmem>>, vector<1x8x128xf32>
    %29 = vector.shape_cast %28 : vector<1x8x128xf32> to vector<8x128xf32>
    %30 = vector.shape_cast %27 : vector<8x128xf32> to vector<1x8x128xf32>
    tpu.vector_store %arg6[%c0_23, %c0_24, %c0_25], %30 {strides = array<i32>} : memref<1x8x128xf32, #tpu.memory_space<vmem>>, vector<1x8x128xf32>,
    return
  }
  func.func @transform_0(%arg0: i32, %arg1: i32) -> (i32, i32, i32) {
    %c0_i32 = arith.constant 0 : i32
    %c0_i32_0 = arith.constant 0 : i32
    return %arg0, %arg1, %c0_i32 : i32, i32, i32
  }
  func.func @transform_1(%arg0: i32, %arg1: i32) -> (i32, i32, i32) {
    %c0_i32 = arith.constant 0 : i32
    %c0_i32_0 = arith.constant 0 : i32
    return %arg0, %arg1, %c0_i32 : i32, i32, i32
  }
  func.func @transform_2(%arg0: i32, %arg1: i32) -> (i32, i32, i32) {
    %c0_i32 = arith.constant 0 : i32
    %c0_i32_0 = arith.constant 0 : i32
    %c0_i32_1 = arith.constant 0 : i32
    return %arg0, %c0_i32, %c0_i32_0 : i32, i32, i32
  }
  func.func @transform_3(%arg0: i32, %arg1: i32) -> (i32, i32, i32) {
    %c0_i32 = arith.constant 0 : i32
    %c0_i32_0 = arith.constant 0 : i32
    %c0_i32_1 = arith.constant 0 : i32
    return %arg0, %c0_i32, %c0_i32_0 : i32, i32, i32
  }
  func.func @transform_4(%arg0: i32, %arg1: i32) -> (i32, i32, i32) {
    %c0_i32 = arith.constant 0 : i32
    %c0_i32_0 = arith.constant 0 : i32
    %c0_i32_1 = arith.constant 0 : i32
    return %arg0, %c0_i32, %c0_i32_0 : i32, i32, i32
  }
}

</mosaic_0001>

<bundles_post_ra>
// kernel: tpu_custom_call.1
= control target key start
LH: loop header
LB: loop body
LE: loop exit
PB: predicated region body
PF: predicated region fallthrough
CT: control target
= control target key end

     0   :  { %s1160_s0 = inlined_call_operand.hbm [shape: f32[2,8,128], index: 0, kind: input, shape index: {}]   ;;  %s1161_s1 = inlined_call_operand.hbm [shape: f32[2,8,128], index: 1, kind: input, shape index: {}]   ;;  %s1162_s2 = inlined_call_operand.hbm [shape: f32[2,8,128], index: 2, kind: output, shape index: {0}]   ;;  %s1163_s3 = inlined_call_operand.hbm [shape: f32[2,8,128], index: 3, kind: output, shape index: {1}]   ;;  %s1164_s4 = inlined_call_operand.hbm [shape: f32[2,8,128], index: 4, kind: output, shape index: {2}]  }
   0x1   :  { %1169 = sst [smem:[#allocation15_spill]] %s1160_s0 }
   0x2   :  { %1170 = sst [smem:[#allocation16_spill]] %s1161_s1 }
   0x3   :  { %10 = vsyncpa [#allocation3], 0 }
   0x4   :  { %12 = vsyncpa [#allocation3 + $0x1], 0 }
   0x5   :  { %13 = vsyncpa [#allocation6], 0 }
   0x6   :  { %15 = vsyncpa [#allocation6 + $0x1], 0 }
   0x7   :  { %16 = vsyncpa [#allocation4], 0 }
   0x8   :  { %18 = vsyncpa [#allocation4 + $0x1], 0 }
   0x9   :  { %19 = vsyncpa [#allocation9], 0 }
   0xa   :  { %21 = vsyncpa [#allocation9 + $0x1], 0  ;;  %s860_s15 = smov 0   ;;  %s862_s16 = smov 0  }
   0xb   :  { %s864_s17 = smov 0   ;;  %s866_s18 = smov 0  }
   0xc   :  { %s868_s19 = smov 0   ;;  %s870_s20 = smov 0  }
   0xd LB: > { %s891_s21 = sadd.s32 4294967295, %s828_s20   ;;  %s1165_s22 = sadd.s32 4294967294, %s828_s20   ;;  %s828_s20 = sphi %s870_s20, %s27_s20   ;;  %s824_s19 = sphi %s868_s19, %s1192_s19   ;;  %s820_s18 = sphi %s866_s18, %s1191_s18   ;;  %s816_s17 = sphi %s864_s17, %s1190_s17   ;;  %s812_s16 = sphi %s862_s16, %s1189_s16   ;;  %s808_s15 = sphi %s860_s15, %s1188_s15  }
   0xe   : > { %s39_s23 = sadd.s32 1, %s824_s19  ;;  %s48_s24 = sadd.s32 1, %s816_s17 }
   0xf   : > { %p41_p0 = scmp.ge.s32.totalorder %s39_s23, 2  ;;  %p55_p1 = scmp.ne.s32.totalorder %s816_s17, %s812_s16 }
  0x10   : > { %p56_p2 = scmp.eq.s32.totalorder %s828_s20, 0  ;;  %p61_p3 = scmp.ne.s32.totalorder %s812_s16, %s808_s15 }
  0x11   : > { %s1194_s23 = smov (%p41_p0, %s39_s23), 0  ;;  %p62_p5 = scmp.eq.s32.totalorder %s891_s21, 0 }
  0x12   : > { %p903_p4 = por %p56_p2, %p55_p1  ;;  %s43_s26 = ssub.s32 %s824_s19, %s1194_s23 }
  0x13   : > { %p113_p6 = scmp.eq.s32.totalorder %s891_s21, 1  ;;  %p46_p7 = scmp.eq.s32.totalorder %s43_s26, 0 }
  0x14   : > { %p911_p8 = por %p62_p5, %p61_p3  ;;  %p119_p10 = scmp.eq.s32.totalorder %s1165_s22, 1 }
  0x15   : > { %p915_p9 = por %p113_p6, %p55_p1  ;;  %p571_p13 = scmp.lt.s32.totalorder %s828_s20, 2 }
  0x16   : > { %s1172_s27 = scalar_select %p911_p8, 1, 0 }
  0x17   : > { %s1173_s28 = scalar_select %p915_p9, 1, 0 }
  0x18   : > { %s922_s29 = scalar_select %p46_p7, %s816_s17, %s48_s24  }
  0x19   : > { %p924_p11 = por %p119_p10, %p61_p3  ;;  %s931_s5 = sand.u32 1, %s816_s17  }
  0x1a   : > { %s526_s6 = sshll.u32 %s931_s5, 3  ;;  %s527_s7 = sshll.u32 %s824_s19, 7 }
  0x1b   : > { %s1174_s30 = scalar_select %p924_p11, 1, 0 }
  0x1c   : > { %s1175_s0 = sld [smem:[#allocation15_spill]]  ;;  %s195_s11 = scalar_lea.vmem [#allocation2], %s526_s6 }
  0x1d   : > { %s203_s12 = sshll.u32 %s195_s11, 4  ;;  %p948_p0 = pnand %p571_p13, %p903_p4  ;;  %s944_s12 = int_to_ptr.vmem [resolvable:$true] %s203_s12 }
  0x1e   : > { %s192_s14 = scalar_lea.sflag [#allocation3], %s931_s5 }
  0x1f   : > { %p624_p5 = pneg %p948_p0 }
  0x22   : > { %s940_s10 = scalar_lea.hbm %s1175_s0, %s527_s7  ;;  %s627_s25 = scalar_lea.hbm %s1175_s0, 256 }
  0x23   : > { %s622_s24 = scalar_lea.hbm %s940_s10, 128  ;;  %p628_p4 = scmp.lt.u32.totalorder %s940_s10, %s1175_s0 }
  0x24   : > { %p623_p3 = scmp.ne.s32.totalorder %s940_s10, %s622_s24  ;;  %p629_p10 = scmp.lt.u32.totalorder %s627_s25, %s622_s24 }
  0x25   : > { %p631_p12 = scmp.lt.u32.totalorder %s622_s24, %s940_s10 }
  0x26   : > { %p625_p6 = pnand %p624_p5, %p623_p3  ;;  %p630_p13 = por %p629_p10, %p628_p4 }
  0x28   : > { %p626_p7 = pneg %p625_p6  ;;  %p632_p1 = por %p631_p12, %p630_p13 }
  0x2a   : > { %p633_p2 = pnand %p632_p1, %p626_p7 }
  0x2c   : > { %636 = shalt.err (!%p633_p2)
}
  0x2d   : > { %s637_s22 = scalar_lea.vmem %s944_s12, 128  ;;  %s830_s26 = smov [#allocation2]  }
  0x2e   : > { %p638_p3 = scmp.ne.s32.totalorder %s944_s12, %s637_s22  ;;  %s642_s8 = sshll.u32 %s830_s26, 4  ;;  %s643_s8 = int_to_ptr.vmem [resolvable:$false] %s642_s8 }
  0x2f   : > { %s644_s9 = scalar_lea.vmem %s643_s8, 256  ;;  %p645_p9 = scmp.lt.s32.totalorder %s944_s12, %s643_s8 }
  0x30   : > { %p640_p6 = pnand %p638_p3, %p624_p5  ;;  %p646_p4 = scmp.lt.s32.totalorder %s644_s9, %s637_s22 }
  0x32   : > { %p641_p11 = pneg %p640_p6  ;;  %p647_p10 = por %p646_p4, %p645_p9 }
  0x34   : > { %p648_p12 = pnand %p647_p10, %p641_p11 }
  0x36   : > { %651 = shalt.err (!%p648_p12)
}
  0x37   : > { %557 = dma.hbm_to_vmem [thread:$0]  (!%p948_p0), %s940_s10, 128, %s944_s12, %s192_s14  }
  0x38   : > { %p1177_p1 = scmp.lt.s32.totalorder %s828_s20, 3  ;;  %p1178_p2 = scmp.ge.s32.totalorder %s828_s20, 1 }
  0x39   : > { %s1180_s1 = sld [smem:[#allocation16_spill]]  ;;  %s214_s26 = scalar_lea.vmem [#allocation5], %s526_s6 }
  0x3a   : > { %p984_p7 = pnand %p1178_p2, %p1177_p1  ;;  %s222_s8 = sshll.u32 %s214_s26, 4  ;;  %s223_s8 = int_to_ptr.vmem [resolvable:$true] %s222_s8 }
  0x3b   : > { %s211_s10 = scalar_lea.sflag [#allocation6], %s931_s5 }
  0x3c   : > { %s1179_s24 = scalar_select %p984_p7, 1, 0 }
  0x3f   : > { %s993_s11 = scalar_lea.hbm %s1180_s1, %s527_s7  ;;  %s657_s7 = scalar_lea.hbm %s1180_s1, 256 }
  0x40   : > { %s652_s12 = scalar_lea.hbm %s993_s11, 128  ;;  %p658_p3 = scmp.lt.u32.totalorder %s993_s11, %s1180_s1 }
  0x41   : > { %p653_p9 = scmp.ne.s32.totalorder %s993_s11, %s652_s12  ;;  %p659_p6 = scmp.lt.u32.totalorder %s657_s7, %s652_s12 }
  0x42   : > { %p661_p10 = scmp.lt.u32.totalorder %s652_s12, %s993_s11 }
  0x43   : > { %p655_p11 = pnand %p653_p9, %p624_p5  ;;  %p660_p4 = por %p659_p6, %p658_p3 }
  0x45   : > { %p656_p13 = pneg %p655_p11  ;;  %p662_p12 = por %p661_p10, %p660_p4 }
  0x47   : > { %p663_p1 = pnand %p662_p12, %p656_p13 }
  0x49   : > { %666 = shalt.err (!%p663_p1)
}
  0x4a   : > { %s667_s5 = scalar_lea.vmem %s223_s8, 128  ;;  %s831_s6 = smov [#allocation5]  }
  0x4b   : > { %p668_p2 = scmp.ne.s32.totalorder %s223_s8, %s667_s5  ;;  %s672_s26 = sshll.u32 %s831_s6, 4  ;;  %s673_s26 = int_to_ptr.vmem [resolvable:$false] %s672_s26 }
  0x4c   : > { %s674_s14 = scalar_lea.vmem %s673_s26, 256  ;;  %p675_p8 = scmp.lt.s32.totalorder %s223_s8, %s673_s26 }
  0x4d   : > { %p670_p9 = pnand %p668_p2, %p624_p5  ;;  %p676_p7 = scmp.lt.s32.totalorder %s674_s14, %s667_s5 }
  0x4f   : > { %p671_p11 = pneg %p670_p9  ;;  %p677_p3 = por %p676_p7, %p675_p8 }
  0x51   : > { %p678_p6 = pnand %p677_p3, %p671_p11 }
  0x53   : > { %681 = shalt.err (!%p678_p6)
}
  0x54   : > { %560 = dma.hbm_to_vmem [thread:$0]  (!%p948_p0), %s993_s11, 128, %s223_s8, %s211_s10  }
  0x55   : > { %p1181_p13 = scmp.ne.s32.totalorder %s1179_s24, 0 }
  0x56   : > { %s1020_s12 = sand.u32 (!%p1181_p13), 1, %s812_s16   ;;  %p1182_p8 = scmp.ne.s32.totalorder (!%p1181_p13), %s1172_s27, 0 }
  0x57   : > { %231 = sbr.rel (%p1181_p13) target bundleno = 172 (0xac), region = 28  ;;  %s1023_s9 = sshll.u32 (!%p1181_p13), %s1020_s12, 3 }
  0x58   : > { %s234_s7 = scalar_lea.sflag (!%p1181_p13), [#allocation3], %s1020_s12  ;;  %s237_s22 = scalar_lea.vmem (!%p1181_p13), [#allocation2], %s1023_s9 }
  0x5e   : > { %791 = dma.done.wait (%p1182_p8), %s234_s7, 128  }
  0x5f   : > { %793 = vsyncadd (%p1182_p8), %s234_s7, 4294967168  ;;  %s243_s13 = scalar_lea.sflag [#allocation6], %s1020_s12  ;;  %s246_s24 = scalar_lea.vmem [#allocation5], %s1023_s9 }
  0x60   : > { %795 = dma.done.wait (%p1182_p8), %s243_s13, 128  }
  0x61   : > { %797 = vsyncadd (%p1182_p8), %s243_s13, 4294967168  ;;  %s313_s11 = sand.u32 1, %s891_s21   ;;  %s285_s8 = scalar_lea.vmem [#allocation10], %s1023_s9  ;;  %v293_v0 = vld [vmem:[%s237_s22] sm:$0xff]  ;;  %v294_v1 = vld [vmem:[%s246_s24] sm:$0xff] }
  0x62   : > { %s358_s10 = sshll.u32 %s285_s8, 4  ;;  %s539_s25 = sshll.u32 %s820_s18, 7  ;;  %v296_v2 = vmul.f32 %v294_v1, %v293_v0  ;;  %307 = vst [vmem:[%s285_s8] sm:$0xff] %v294_v1  ;;  %s1041_s10 = int_to_ptr.vmem [resolvable:$true] %s358_s10 }
  0x63   : > { %s278_s5 = scalar_lea.vmem [#allocation8], %s1023_s9  ;;  %s1168_s26 = scalar_lea.vmem [#allocation7], %s1023_s9 }
  0x64   : > { %s345_s6 = sshll.u32 %s278_s5, 4  ;;  %s332_s27 = sshll.u32 %s1168_s26, 4  ;;  %303 = vst [vmem:[%s278_s5] sm:$0xff] %v293_v0  ;;  %s1051_s6 = int_to_ptr.vmem [resolvable:$true] %s345_s6  ;;  %s1063_s27 = int_to_ptr.vmem [resolvable:$true] %s332_s27 }
  0x65   : > { %s1049_s13 = scalar_lea.hbm %s1163_s3, %s539_s25  ;;  %s1056_s0 = scalar_lea.hbm %s1164_s4, %s539_s25 }
  0x66   : > { %s1061_s26 = scalar_lea.hbm %s1162_s2, %s539_s25  ;;  %s1065_s14 = scalar_lea.sflag [#allocation9], %s313_s11 }
  0x67   : > { %s682_s7 = scalar_lea.vmem %s1051_s6, 128  ;;  %p1183_p5 = scmp.ne.s32.totalorder %s1173_s28, 0 }
  0x68   : > { %p683_p0 = scmp.ne.s32.totalorder %s1051_s6, %s682_s7  ;;  %s832_s21 = smov [#allocation8]  }
  0x69   : > { %s686_s18 = sshll.u32 %s832_s21, 4  ;;  %s687_s18 = int_to_ptr.vmem [resolvable:$false] %s686_s18 }
  0x6a   : > { %p684_p7 = pnand %p683_p0, %p1183_p5  ;;  %s688_s1 = scalar_lea.vmem %s687_s18, 256 }
  0x6b   : > { %p689_p10 = scmp.lt.s32.totalorder %s1051_s6, %s687_s18  ;;  %p690_p12 = scmp.lt.s32.totalorder %s688_s1, %s682_s7 }
  0x6c   : > { %p685_p4 = pneg %p684_p7 }
  0x6d   : > { %p691_p1 = por %p690_p12, %p689_p10 }
  0x6f   : > { %p692_p2 = pnand %p691_p1, %p685_p4 }
  0x71   : > { %695 = shalt.err (!%p692_p2)
}
  0x72   : > { %s696_s11 = scalar_lea.hbm %s1049_s13, 128  ;;  %s700_s5 = scalar_lea.hbm %s1163_s3, 256 }
  0x73   : > { %p697_p9 = scmp.ne.s32.totalorder %s1049_s13, %s696_s11  ;;  %p701_p6 = scmp.lt.u32.totalorder %s1049_s13, %s1163_s3 }
  0x74   : > { %p702_p13 = scmp.lt.u32.totalorder %s700_s5, %s696_s11  ;;  %p704_p0 = scmp.lt.u32.totalorder %s696_s11, %s1049_s13 }
  0x75   : > { %p698_p11 = pnand %p697_p9, %p1183_p5 }
  0x76   : > { %p703_p8 = por %p702_p13, %p701_p6 }
  0x77   : > { %p699_p3 = pneg %p698_p11 }
  0x78   : > { %p705_p7 = por %p704_p0, %p703_p8 }
  0x7a   : > { %p706_p4 = pnand %p705_p7, %p699_p3 }
  0x7c   : > { %709 = shalt.err (!%p706_p4)
}
  0x7d   : > { %549 = dma.vmem_to_hbm [thread:$0]  (%p1183_p5), %s1051_s6, 128, %s1049_s13, %s1065_s14  }
  0x7e   : > { %s1184_s1 = scalar_lea.vmem [#allocation7], %s1023_s9  ;;  %s710_s7 = scalar_lea.vmem %s1041_s10, 128 }
  0x7f   : > { %299 = vst [vmem:[%s1184_s1] sm:$0xff] %v296_v2  ;;  %p711_p10 = scmp.ne.s32.totalorder %s1041_s10, %s710_s7  ;;  %s833_s21 = smov [#allocation10]  }
  0x80   : > { %s714_s18 = sshll.u32 %s833_s21, 4  ;;  %s715_s18 = int_to_ptr.vmem [resolvable:$false] %s714_s18 }
  0x81   : > { %p712_p12 = pnand %p711_p10, %p1183_p5  ;;  %s716_s11 = scalar_lea.vmem %s715_s18, 256 }
  0x82   : > { %p717_p2 = scmp.lt.s32.totalorder %s1041_s10, %s715_s18  ;;  %p718_p9 = scmp.lt.s32.totalorder %s716_s11, %s710_s7 }
  0x83   : > { %p713_p1 = pneg %p712_p12 }
  0x84   : > { %p719_p11 = por %p718_p9, %p717_p2 }
  0x86   : > { %p720_p3 = pnand %p719_p11, %p713_p1 }
  0x88   : > { %723 = shalt.err (!%p720_p3)
}
  0x89   : > { %s724_s9 = scalar_lea.hbm %s1056_s0, 128  ;;  %s728_s8 = scalar_lea.hbm %s1164_s4, 256 }
  0x8a   : > { %p725_p6 = scmp.ne.s32.totalorder %s1056_s0, %s724_s9  ;;  %p729_p0 = scmp.lt.u32.totalorder %s1056_s0, %s1164_s4 }
  0x8b   : > { %p730_p7 = scmp.lt.u32.totalorder %s728_s8, %s724_s9  ;;  %p732_p10 = scmp.lt.u32.totalorder %s724_s9, %s1056_s0 }
  0x8c   : > { %p726_p13 = pnand %p725_p6, %p1183_p5 }
  0x8d   : > { %p731_p4 = por %p730_p7, %p729_p0 }
  0x8e   : > { %p727_p8 = pneg %p726_p13 }
  0x8f   : > { %p733_p12 = por %p732_p10, %p731_p4 }
  0x91   : > { %p734_p1 = pnand %p733_p12, %p727_p8 }
  0x93   : > { %737 = shalt.err (!%p734_p1)
}
  0x94   : > { %550 = dma.vmem_to_hbm [thread:$0]  (%p1183_p5), %s1041_s10, 128, %s1056_s0, %s1065_s14  }
  0x95   : > { %s309_s22 = scalar_lea.sflag [#allocation4], %s1020_s12  ;;  %s738_s24 = scalar_lea.vmem %s1063_s27, 128 }
  0x96   : > { %p739_p2 = scmp.ne.s32.totalorder %s1063_s27, %s738_s24  ;;  %s834_s1 = smov [#allocation7]  }
  0x97   : > { %s742_s7 = sshll.u32 %s834_s1, 4  ;;  %s743_s7 = int_to_ptr.vmem [resolvable:$false] %s742_s7 }
  0x98   : > { %p740_p9 = pnand %p739_p2, %p1183_p5  ;;  %s744_s21 = scalar_lea.vmem %s743_s7, 256 }
  0x99   : > { %p745_p3 = scmp.lt.s32.totalorder %s1063_s27, %s743_s7  ;;  %p746_p6 = scmp.lt.s32.totalorder %s744_s21, %s738_s24 }
  0x9a   : > { %p741_p11 = pneg %p740_p9 }
  0x9b   : > { %p747_p13 = por %p746_p6, %p745_p3 }
  0x9d   : > { %p748_p8 = pnand %p747_p13, %p741_p11 }
  0x9f   : > { %751 = shalt.err (!%p748_p8)
}
  0xa0   : > { %s752_s0 = scalar_lea.hbm %s1061_s26, 128  ;;  %s756_s14 = scalar_lea.hbm %s1162_s2, 256 }
  0xa1   : > { %p753_p0 = scmp.ne.s32.totalorder %s1061_s26, %s752_s0  ;;  %p757_p10 = scmp.lt.u32.totalorder %s1061_s26, %s1162_s2 }
  0xa2   : > { %p758_p12 = scmp.lt.u32.totalorder %s756_s14, %s752_s0  ;;  %p760_p2 = scmp.lt.u32.totalorder %s752_s0, %s1061_s26 }
  0xa3   : > { %p754_p7 = pnand %p753_p0, %p1183_p5 }
  0xa4   : > { %p759_p1 = por %p758_p12, %p757_p10 }
  0xa5   : > { %p755_p4 = pneg %p754_p7 }
  0xa6   : > { %p761_p9 = por %p760_p2, %p759_p1 }
  0xa8   : > { %p762_p11 = pnand %p761_p9, %p755_p4 }
  0xaa   : > { %765 = shalt.err (!%p762_p11)
}
  0xab   : > { %548 = dma.vmem_to_hbm [thread:$0]  (%p1183_p5), %s1063_s27, 128, %s1061_s26, %s309_s22  }
  0xac PF: > { %s370_s9 = sand.u32 1, %s808_s15   ;;  %p1185_p3 = scmp.ne.s32.totalorder %s1174_s30, 0 }
  0xad   : > { %p1186_p6 = scmp.ge.s32.totalorder %s828_s20, 2  ;;  %s371_s6 = scalar_lea.sflag [#allocation4], %s370_s9 }
  0xaf   : > { %p562_p13 = pnand %p1186_p6, %p1185_p3 }
  0xb1   : > { %799 = dma.done.wait (!%p562_p13), %s371_s6, 128  }
  0xb2   : > { %801 = vsyncadd (!%p562_p13), %s371_s6, 4294967168  ;;  %s1187_s13 = sadd.s32 4294967294, %s828_s20  }
  0xb3   : > { %s379_s8 = sand.u32 1, %s1187_s13  }
  0xb4   : > { %s380_s25 = scalar_lea.sflag [#allocation9], %s379_s8 }
  0xb5   : > { %803 = dma.done.wait (!%p562_p13), %s380_s25, 256  }
  0xb6   : > { %805 = vsyncadd (!%p562_p13), %s380_s25, 4294967040  ;;  %s27_s20 = sadd.s32 1, %s828_s20   ;;  %s1188_s15 = smov %s812_s16 }
  0xb7   : > { %p24_p5 = scmp.ge.s32.totalorder %s27_s20, 4   ;;  %s1189_s16 = smov %s816_s17 }
  0xb8   : > { %s1190_s17 = smov %s922_s29  ;;  %s1191_s18 = smov %s824_s19 }
  0xb9   : > { %s1192_s19 = smov %s1194_s23  ;;  %26 = sbr.rel (!%p24_p5) target bundleno = 13 (0xd), region = 122 }
  0xc0   :  { %394 = vsyncpa [#allocation3], 1 }
  0xc1   :  { %396 = vsyncpa [#allocation3 + $0x1], 1 }
  0xc2   :  { %397 = vsyncpa [#allocation6], 1 }
  0xc3   :  { %399 = vsyncpa [#allocation6 + $0x1], 1 }
  0xc4   :  { %400 = vsyncpa [#allocation4], 1 }
  0xc5   :  { %402 = vsyncpa [#allocation4 + $0x1], 1 }
  0xc6   :  { %403 = vsyncpa [#allocation9], 1 }
  0xc7   :  { %405 = vsyncpa [#allocation9 + $0x1], 1 }

</bundles_post_ra>
